<compile_context>
chip_gen: v7x
topology: tpu7x:2x2x1
jax: 0.10.0
libtpu: 0.0.40
codegen_flags: <defaults>
</compile_context>

<pallas_src>
import functools

import jax
import jax.numpy as jnp
from jax.experimental import pallas as pl
from jax.experimental.pallas import tpu as pltpu


P_DROP = 0.5
_LANE = 512                          # lane-dense block width (4 * 128 lanes)
_MAX_BLOCK_BYTES = 2 * 1024 * 1024   # per-block budget; in+out double-buffered = 8 MiB


def _round_up(x, m):
    return (x + m - 1) // m * m


def _choose_block_rows(rows, itemsize):
    """Sublane-aligned block height, capped at ~2 MiB per block."""
    align = 8 * max(1, 4 // itemsize)          # f32: 8, bf16: 16, 8-bit: 32
    if rows <= align:
        return rows                            # single full-extent block (always layout-legal)
    max_rows = max(align, (_MAX_BLOCK_BYTES // (_LANE * itemsize)) // align * align)
    return min(max_rows, _round_up(rows, align))


def _dropout_prng_kernel(seed_ref, x_ref, o_ref, *, threshold, scale):
    """TPU path: dropout mask generated on-chip (no mask DMA from HBM)."""
    # Two seed operands are hash-mixed by the seeding op, so (seed s, block i+1)
    # and (seed s+1, block i) do not share a PRNG stream.
    pltpu.prng_seed(seed_ref[0], pl.program_id(0))
    raw = pltpu.bitcast(pltpu.prng_random_bits(x_ref.shape), jnp.uint32)
    keep = raw >= jnp.uint32(threshold)        # P(keep) = 1 - p, full 32-bit compare
    scaled = x_ref[...].astype(jnp.float32) * jnp.float32(scale)
    o_ref[...] = jnp.where(keep, scaled, 0.0).astype(o_ref.dtype)


def _dropout_bits_kernel(x_ref, bits_ref, o_ref, *, threshold, scale):
    """Portable path (CPU / interpret): random words streamed in as an input."""
    keep = bits_ref[...] >= jnp.uint32(threshold)
    scaled = x_ref[...].astype(jnp.float32) * jnp.float32(scale)
    o_ref[...] = jnp.where(keep, scaled, 0.0).astype(o_ref.dtype)


def dropout(x, seed, p=P_DROP, training=True):
    """Pallas dropout matching nn.Dropout(p) forward (training mode)."""
    if not training or p == 0.0:
        return x
    if p >= 1.0:
        return jnp.zeros_like(x)

    orig_shape = x.shape
    dtype = x.dtype
    n = x.size
    itemsize = jnp.dtype(dtype).itemsize
    threshold = min(int(round(float(p) * 2.0 ** 32)), 2 ** 32 - 1)
    scale = 1.0 / (1.0 - float(p))

    # Flatten to a lane-dense (rows, 512) slab in the native dtype.  Only the
    # final sub-512 remainder (if any) is padded; rows are NOT rounded up to a
    # block_rows multiple -- Pallas masks the ragged last block.
    xf = jnp.ravel(x)
    rows = pl.cdiv(n, _LANE)
    pad = rows * _LANE - n
    if pad:
        xf = jnp.pad(xf, (0, pad))
    x2 = xf.reshape(rows, _LANE)

    block_rows = _choose_block_rows(rows, itemsize)
    grid = (pl.cdiv(rows, block_rows),)
    out_shape = jax.ShapeDtypeStruct((rows, _LANE), dtype)
    cost = pl.CostEstimate(flops=0, transcendentals=0,
                           bytes_accessed=2 * rows * _LANE * itemsize)

    if jax.default_backend() == "tpu":
        kern = functools.partial(_dropout_prng_kernel,
                                 threshold=threshold, scale=scale)
        seed_arr = jnp.asarray([seed], dtype=jnp.int32)
        out2 = pl.pallas_call(
            kern,
            out_shape=out_shape,
            grid_spec=pltpu.PrefetchScalarGridSpec(
                num_scalar_prefetch=1,                    # seed lands in SMEM
                grid=grid,
                in_specs=[pl.BlockSpec((block_rows, _LANE),
                                       lambda i, seed_ref: (i, 0))],
                out_specs=pl.BlockSpec((block_rows, _LANE),
                                       lambda i, seed_ref: (i, 0)),
            ),
            compiler_params=pltpu.CompilerParams(
                dimension_semantics=("parallel",),
                vmem_limit_bytes=32 * 1024 * 1024),
            cost_estimate=cost,
        )(seed_arr, x2)
    else:
        # pltpu.prng_* has no CPU lowering -> feed precomputed random words.
        bits = jax.random.bits(jax.random.PRNGKey(seed), (rows, _LANE),
                               dtype=jnp.uint32)
        kern = functools.partial(_dropout_bits_kernel,
                                 threshold=threshold, scale=scale)
        out2 = pl.pallas_call(
            kern,
            out_shape=out_shape,
            grid=grid,
            in_specs=[pl.BlockSpec((block_rows, _LANE), lambda i: (i, 0)),
                      pl.BlockSpec((block_rows, _LANE), lambda i: (i, 0))],
            out_specs=pl.BlockSpec((block_rows, _LANE), lambda i: (i, 0)),
            cost_estimate=cost,
        )(x2, bits)

    out_flat = out2.reshape(-1)
    if pad:
        out_flat = out_flat[:n]
    return out_flat.reshape(orig_shape)


if __name__ == "__main__":
    key = jax.random.PRNGKey(0)
    x = jax.random.normal(key, (2, 4, 16, 16), jnp.float32)

    y = dropout(x, seed=0, p=0.5, training=True)
    jax.block_until_ready(y)

    # Shape/dtype preserved.
    assert y.shape == x.shape and y.dtype == x.dtype
    # Every element is either 0 (dropped) or x / (1 - p) (kept & scaled).
    ok = jnp.logical_or(jnp.isclose(y, 0.0),
                        jnp.isclose(y, x / (1.0 - 0.5), rtol=1e-6, atol=1e-6))
    assert bool(jnp.all(ok))
    # Keep fraction statistically ~0.5.
    keep_frac = float(jnp.mean((y != 0.0).astype(jnp.float32)))
    assert 0.3 < keep_frac < 0.7
    # Deterministic for a fixed seed.
    y2 = dropout(x, seed=0, p=0.5, training=True)
    assert bool(jnp.all(y == y2))
    # Eval mode is identity (nn.Dropout in eval()).
    assert bool(jnp.all(dropout(x, seed=0, p=0.5, training=False) == x))
    assert bool(jnp.all(jnp.isfinite(y)))

    # TODO(synk): `.cuda()` in the reference forward is device placement only;
    # the result already lives on the default device here, so it is a no-op.
    print("KERNEL_OK")
</pallas_src>

<mosaic_0001>
module attributes {stable_mosaic.version = 11 : i64} {
  func.func @_dropout_bits_kernel(%arg0: i32, %arg1: memref<4x512xf32, #tpu.memory_space<vmem>>, %arg2: memref<4x512xi32, #tpu.memory_space<vmem>>, %arg3: memref<4x512xf32, #tpu.memory_space<vmem>>) attributes {dimension_semantics = [#tpu.dimension_semantics<arbitrary>], iteration_bounds = array<i64: 1>, scalar_prefetch = 0 : i64, scratch_operands = 0 : i64, tpu.core_type = #tpu.core_type<tc>, window_params = [{transform_indices = @transform_0, window_bounds = array<i64: 4, 512>}, {transform_indices = @transform_1, window_bounds = array<i64: 4, 512>}, {transform_indices = @transform_2, window_bounds = array<i64: 4, 512>}]} {
    %c0 = arith.constant 0 : index
    %c0_0 = arith.constant 0 : index
    %0 = vector.load %arg2[%c0, %c0_0] : memref<4x512xi32, #tpu.memory_space<vmem>>, vector<4x512xi32>
    %c-2147483648_i32 = arith.constant -2147483648 : i32
    %1 = vector.broadcast %c-2147483648_i32 : i32 to vector<4x512xi32>
    %2 = arith.cmpi uge, %0, %1 : vector<4x512xi32>
    %c0_1 = arith.constant 0 : index
    %c0_2 = arith.constant 0 : index
    %3 = vector.load %arg1[%c0_1, %c0_2] : memref<4x512xf32, #tpu.memory_space<vmem>>, vector<4x512xf32>
    %cst = arith.constant 2.000000e+00 : f32
    %4 = vector.broadcast %cst : f32 to vector<4x512xf32>
    %5 = arith.mulf %3, %4 : vector<4x512xf32>
    %cst_3 = arith.constant 0.000000e+00 : f32
    %6 = vector.broadcast %cst_3 : f32 to vector<4x512xf32>
    %7 = arith.select %2, %5, %6 : vector<4x512xi1>, vector<4x512xf32>
    %c0_4 = arith.constant 0 : index
    %c0_5 = arith.constant 0 : index
    %8 = vector.load %arg3[%c0_4, %c0_5] : memref<4x512xf32, #tpu.memory_space<vmem>>, vector<4x512xf32>
    tpu.vector_store %arg3[%c0_4, %c0_5], %7 {strides = array<i32>} : memref<4x512xf32, #tpu.memory_space<vmem>>, vector<4x512xf32>,
    return
  }
  func.func @transform_0(%arg0: i32) -> (i32, i32) {
    %c0_i32 = arith.constant 0 : i32
    %c0_i32_0 = arith.constant 0 : i32
    return %arg0, %c0_i32 : i32, i32
  }
  func.func @transform_1(%arg0: i32) -> (i32, i32) {
    %c0_i32 = arith.constant 0 : i32
    %c0_i32_0 = arith.constant 0 : i32
    return %arg0, %c0_i32 : i32, i32
  }
  func.func @transform_2(%arg0: i32) -> (i32, i32) {
    %c0_i32 = arith.constant 0 : i32
    %c0_i32_0 = arith.constant 0 : i32
    return %arg0, %c0_i32 : i32, i32
  }
}

</mosaic_0001>

<bundles_post_ra>
// kernel: tpu_custom_call.1
= control target key start
LH: loop header
LB: loop body
LE: loop exit
PB: predicated region body
PF: predicated region fallthrough
CT: control target
= control target key end

     0   :  { %7 = vsyncpa [#allocation3], 0  ;;  %s193_s0 = inlined_call_operand.hbm [shape: f32[4,512], index: 0, kind: input, shape index: {}]   ;;  %s194_s1 = inlined_call_operand.hbm [shape: u32[4,512], index: 1, kind: input, shape index: {}]   ;;  %s195_s2 = inlined_call_operand.hbm [shape: f32[4,512], index: 2, kind: output, shape index: {}]  }
   0x1   :  { %8 = vsyncpa [#allocation6], 0 }
   0x2   :  { %9 = vsyncpa [#allocation4], 0  ;;  %s139_s9 = smov [#allocation2]   ;;  %s140_s11 = smov [#allocation5]  }
   0x3   :  { %s16_s10 = sshll.u32 %s139_s9, 4  ;;  %s26_s12 = sshll.u32 %s140_s11, 4  ;;  %s17_s10 = int_to_ptr.vmem [resolvable:$true] %s16_s10  ;;  %s27_s12 = int_to_ptr.vmem [resolvable:$true] %s26_s12 }
   0x4   :  { %s67_s15 = scalar_lea.hbm %s193_s0, 256 }
   0x5   :  { %p68_p0 = scmp.ne.s32.totalorder %s193_s0, %s67_s15  ;;  %p71_p1 = scmp.lt.u32.totalorder %s67_s15, %s193_s0 }
   0x7   :  { %p73_p2 = pnand %p71_p1, %p68_p0 }
   0x9   :  { %76 = shalt.err (!%p73_p2)
}
   0xa   :  { %s77_s20 = scalar_lea.vmem %s17_s10, 256  ;;  %p82_p4 = scmp.lt.s32.totalorder %s17_s10, %s17_s10 }
   0xb   :  { %p78_p3 = scmp.ne.s32.totalorder %s17_s10, %s77_s20  ;;  %p83_p5 = scmp.lt.s32.totalorder %s77_s20, %s77_s20 }
   0xd   :  { %p84_p6 = por %p83_p5, %p82_p4 }
   0xf   :  { %p85_p7 = pnand %p84_p6, %p78_p3 }
  0x11   :  { %88 = shalt.err (!%p85_p7)
}
  0x12   :  { %19 = dma.hbm_to_vmem [thread:$0]  %s193_s0, 256, %s17_s10, [#allocation3]  }
  0x13   :  { %s89_s25 = scalar_lea.hbm %s194_s1, 256 }
  0x14   :  { %p90_p8 = scmp.ne.s32.totalorder %s194_s1, %s89_s25  ;;  %p93_p9 = scmp.lt.u32.totalorder %s89_s25, %s194_s1 }
  0x16   :  { %p95_p10 = pnand %p93_p9, %p90_p8 }
  0x18   :  { %98 = shalt.err (!%p95_p10)
}
  0x19   :  { %s99_s30 = scalar_lea.vmem %s27_s12, 256  ;;  %p104_p12 = scmp.lt.s32.totalorder %s27_s12, %s27_s12 }
  0x1a   :  { %p100_p11 = scmp.ne.s32.totalorder %s27_s12, %s99_s30  ;;  %p105_p13 = scmp.lt.s32.totalorder %s99_s30, %s99_s30 }
  0x1c   :  { %p106_p0 = por %p105_p13, %p104_p12 }
  0x1e   :  { %p107_p1 = pnand %p106_p0, %p100_p11 }
  0x20   :  { %110 = shalt.err (!%p107_p1)
}
  0x21   :  { %29 = dma.hbm_to_vmem [thread:$0]  %s194_s1, 256, %s27_s12, [#allocation6]  }
  0x22   :  { %133 = dma.done.wait [#allocation3], 256  }
  0x23   :  { %134 = vsyncadd [#allocation3], 4294967040 }
  0x24   :  { %135 = dma.done.wait [#allocation6], 256  }
  0x25   :  { %136 = vsyncadd [#allocation6], 4294967040  ;;  %v36_v0 = vld [vmem:[#allocation5] sm:$0xff]  ;;  %v40_v1 = vld [vmem:[#allocation2] sm:$0xff]  ;;  %s141_s4 = smov [#allocation7]  }
  0x26   :  { %v37_v2 = vld [vmem:[#allocation5 + $0x8] sm:$0xff]  ;;  %s54_s5 = sshll.u32 %s141_s4, 4  ;;  %vm38_vm0 = vcmp.ge.u32.totalorder %v36_v0, 2147483648  ;;  %v42_v3 = vmul.f32 2.0, %v40_v1  ;;  %v41_v4 = vld [vmem:[#allocation2 + $0x8] sm:$0xff]  ;;  %s55_s5 = int_to_ptr.vmem [resolvable:$true] %s54_s5 }
  0x27   :  { %vm39_vm1 = vcmp.ge.u32.totalorder %v37_v2, 2147483648  ;;  %v43_v5 = vmul.f32 2.0, %v41_v4  ;;  %s111_s1 = scalar_lea.vmem %s55_s5, 256  ;;  %p116_p3 = scmp.lt.s32.totalorder %s55_s5, %s55_s5 }
  0x28   :  { %v44_v6 = vsel %vm38_vm0, %v42_v3, 0.0  ;;  %p112_p2 = scmp.ne.s32.totalorder %s55_s5, %s111_s1  ;;  %p117_p4 = scmp.lt.s32.totalorder %s111_s1, %s111_s1 }
  0x29   :  { %46 = vst [vmem:[#allocation7] sm:$0xff] %v44_v6  ;;  %v45_v7 = vsel %vm39_vm1, %v43_v5, 0.0 }
  0x2a   :  { %47 = vst [vmem:[#allocation7 + $0x8] sm:$0xff] %v45_v7  ;;  %p118_p5 = por %p117_p4, %p116_p3 }
  0x2c   :  { %p119_p6 = pnand %p118_p5, %p112_p2 }
  0x2e   :  { %122 = shalt.err (!%p119_p6)
}
  0x2f   :  { %s123_s8 = scalar_lea.hbm %s195_s2, 256 }
  0x30   :  { %p124_p7 = scmp.ne.s32.totalorder %s195_s2, %s123_s8  ;;  %p127_p8 = scmp.lt.u32.totalorder %s123_s8, %s195_s2 }
  0x32   :  { %p129_p9 = pnand %p127_p8, %p124_p7 }
  0x34   :  { %132 = shalt.err (!%p129_p9)
}
  0x35   :  { %57 = dma.vmem_to_hbm [thread:$0]  %s55_s5, 256, %s195_s2, [#allocation4]  }
  0x36   :  { %137 = dma.done.wait [#allocation4], 256  }
  0x37   :  { %138 = vsyncadd [#allocation4], 4294967040 }
  0x38   :  { %61 = vsyncpa [#allocation3], 1 }
  0x39   :  { %62 = vsyncpa [#allocation6], 1 }
  0x3a   :  { %63 = vsyncpa [#allocation4], 1 }

</bundles_post_ra>
